<compile_context>
chip_gen: v5e
topology: v5e:2x2
jax: 0.10.0
libtpu: 0.0.40
codegen_flags: <defaults>
</compile_context>

<pallas_src>
import jax
import jax.numpy as jnp
from jax.experimental import pallas as pl
from jax.experimental.pallas import tpu as pltpu


def _round_up(v, m):
    return ((v + m - 1) // m) * m


def simplenet_kernel(x_ref, w1_ref, b1_ref, w2t_ref, b2t_ref, out_ref):
    # fc1 + ReLU on the natural (tb, 64) layout; f32 MXU matmul, f32 accumulate.
    h = jnp.dot(x_ref[...], w1_ref[...],
                preferred_element_type=jnp.float32) + b1_ref[...]
    h = jnp.maximum(h, 0.0)                                   # (tb, 32)
    # TODO(synk): Dropout(0.5) is stochastic; implemented as eval-mode identity
    # (training-mode parity would need pltpu.prng_seed + prng_random_bits masking).
    # fc2 computed transposed so the epilogue is lane-dense:
    #   logits_T = w2^T @ h^T  -> (10, tb)
    logits_t = jnp.dot(w2t_ref[...], h.T,
                       preferred_element_type=jnp.float32) + b2t_ref[...]
    # log_softmax over the class axis (axis 0 here == dim=1 of the module),
    # numerically stable, all f32, per batch-column so padded rows stay isolated.
    m = jnp.max(logits_t, axis=0, keepdims=True)              # (1, tb)
    shifted = logits_t - m
    lse = jnp.log(jnp.sum(jnp.exp(shifted), axis=0, keepdims=True))
    out_ref[...] = shifted - lse                              # (10, tb)


def simplenet_forward(x, w1, b1, w2, b2, *, tile_b=4096):
    """x: (B, 64) f32; weights stored (in, out). Returns (B, 10) f32 log-probs."""
    B = x.shape[0]

    # Batch-tile selection:
    #  * B > tile_b         -> tb = tile_b (multiple of 128), grid >= 2.
    #  * 512 <= B <= tile_b -> tb ~= B/2 rounded up to 128 so grid == 2
    #                          (keeps both v7x TensorCores busy).
    #  * tiny B             -> single block covering the whole batch
    #                          (block dims == full array dims, so the (8,128)
    #                          divisibility rule is satisfied trivially).
    if B > tile_b:
        tb = tile_b
    elif B >= 512:
        tb = _round_up(-(-B // 2), 128)
    else:
        tb = B
    n_tiles = -(-B // tb)  # cdiv; ragged last tile is masked by Pallas.

    w2t = jnp.transpose(w2)          # (10, 32) — tiny, one-time
    b2t = jnp.reshape(b2, (10, 1))   # broadcasts over lanes in the kernel

    out_t = pl.pallas_call(
        simplenet_kernel,
        out_shape=jax.ShapeDtypeStruct((10, B), jnp.float32),
        grid=(n_tiles,),
        in_specs=[
            pl.BlockSpec((tb, 64), lambda i: (i, 0)),   # x: streamed per tile
            pl.BlockSpec((64, 32), lambda i: (0, 0)),   # w1: resident
            pl.BlockSpec((1, 32), lambda i: (0, 0)),    # b1: resident
            pl.BlockSpec((10, 32), lambda i: (0, 0)),   # w2^T: resident
            pl.BlockSpec((10, 1), lambda i: (0, 0)),    # b2 as column: resident
        ],
        out_specs=pl.BlockSpec((10, tb), lambda i: (0, i)),
        compiler_params=pltpu.CompilerParams(
            dimension_semantics=("parallel",)),          # megacore sharding
    )(x, w1, b1, w2t, b2t)

    # Kernel writes class-major (10, B) for lane-dense stores; flip the tiny
    # output back to the module's (B, 10) orientation.
    return out_t.T


def reference_forward(x, w1, b1, w2, b2):
    """Pure-JAX f32 reference."""
    h = jnp.maximum(jnp.dot(x, w1, preferred_element_type=jnp.float32) + b1, 0.0)
    logits = jnp.dot(h, w2, preferred_element_type=jnp.float32) + b2
    return jax.nn.log_softmax(logits, axis=1)


def init_params(key):
    # Deterministic init mimicking nn.Linear's U(-1/sqrt(fan_in), 1/sqrt(fan_in)).
    k1, k2, k3, k4 = jax.random.split(key, 4)
    bound1 = 1.0 / jnp.sqrt(64.0)
    bound2 = 1.0 / jnp.sqrt(32.0)
    w1 = jax.random.uniform(k1, (64, 32), jnp.float32, -bound1, bound1)
    b1 = jax.random.uniform(k2, (1, 32), jnp.float32, -bound1, bound1)
    w2 = jax.random.uniform(k3, (32, 10), jnp.float32, -bound2, bound2)
    b2 = jax.random.uniform(k4, (1, 10), jnp.float32, -bound2, bound2)
    return w1, b1, w2, b2


if __name__ == "__main__":
    key = jax.random.PRNGKey(0)
    kx, kp = jax.random.split(key)
    w1, b1, w2, b2 = init_params(kp)

    # Small batch: single-block path (block dims == full array dims).
    B = 8
    x = jax.random.normal(kx, (B, 64), jnp.float32)
    out = jax.block_until_ready(simplenet_forward(x, w1, b1, w2, b2))
    assert out.shape == (B, 10)
    assert jnp.allclose(jnp.sum(jnp.exp(out), axis=1), jnp.ones((B,)), atol=1e-4)
    ref = reference_forward(x, w1, b1, w2, b2)
    assert jnp.allclose(out, ref, atol=2e-3, rtol=2e-3)

    # Larger batch: 2-step grid (tb=640) with a ragged masked last tile, no pad.
    B2 = 1040
    x2 = jax.random.normal(kx, (B2, 64), jnp.float32)
    out2 = jax.block_until_ready(simplenet_forward(x2, w1, b1, w2, b2))
    assert out2.shape == (B2, 10)
    assert jnp.allclose(jnp.sum(jnp.exp(out2), axis=1), jnp.ones((B2,)), atol=1e-4)
    ref2 = reference_forward(x2, w1, b1, w2, b2)
    assert jnp.allclose(out2, ref2, atol=2e-3, rtol=2e-3)

    print("KERNEL_OK")
</pallas_src>

<mosaic_0001>
module attributes {stable_mosaic.version = 11 : i64} {
  func.func @simplenet_kernel(%arg0: i32, %arg1: memref<8x64xf32, #tpu.memory_space<vmem>>, %arg2: memref<64x32xf32, #tpu.memory_space<vmem>>, %arg3: memref<1x32xf32, #tpu.memory_space<vmem>>, %arg4: memref<10x32xf32, #tpu.memory_space<vmem>>, %arg5: memref<10x1xf32, #tpu.memory_space<vmem>>, %arg6: memref<10x8xf32, #tpu.memory_space<vmem>>) attributes {dimension_semantics = [#tpu.dimension_semantics<parallel>], iteration_bounds = array<i64: 1>, scalar_prefetch = 0 : i64, scratch_operands = 0 : i64, tpu.core_type = #tpu.core_type<tc>, window_params = [{transform_indices = @transform_0, window_bounds = array<i64: 8, 64>}, {pipeline_mode = #tpu.pipeline_mode<synchronous>, transform_indices = @transform_1, window_bounds = array<i64: 64, 32>}, {pipeline_mode = #tpu.pipeline_mode<synchronous>, transform_indices = @transform_2, window_bounds = array<i64: 1, 32>}, {pipeline_mode = #tpu.pipeline_mode<synchronous>, transform_indices = @transform_3, window_bounds = array<i64: 10, 32>}, {pipeline_mode = #tpu.pipeline_mode<synchronous>, transform_indices = @transform_4, window_bounds = array<i64: 10, 1>}, {transform_indices = @transform_5, window_bounds = array<i64: 10, 8>}]} {
    %c0 = arith.constant 0 : index
    %c0_0 = arith.constant 0 : index
    %0 = vector.load %arg1[%c0, %c0_0] : memref<8x64xf32, #tpu.memory_space<vmem>>, vector<8x64xf32>
    %c0_1 = arith.constant 0 : index
    %c0_2 = arith.constant 0 : index
    %1 = vector.load %arg2[%c0_1, %c0_2] : memref<64x32xf32, #tpu.memory_space<vmem>>, vector<64x32xf32>
    %cst = arith.constant dense<0.000000e+00> : vector<8x32xf32>
    %2 = tpu.matmul %0, %1, %cst {dimension_numbers = #tpu.dot_dimension_numbers<[1], [0], [0], [1], [0, 0, 1, 1], [], []>} : vector<8x64xf32>, vector<64x32xf32>, vector<8x32xf32> -> vector<8x32xf32>
    %c0_3 = arith.constant 0 : index
    %c0_4 = arith.constant 0 : index
    %3 = vector.load %arg3[%c0_3, %c0_4] : memref<1x32xf32, #tpu.memory_space<vmem>>, vector<1x32xf32>
    %4 = vector.broadcast %3 : vector<1x32xf32> to vector<8x32xf32>
    %5 = arith.addf %2, %4 : vector<8x32xf32>
    %cst_5 = arith.constant 0.000000e+00 : f32
    %6 = vector.broadcast %cst_5 : f32 to vector<8x32xf32>
    %7 = arith.maximumf %5, %6 : vector<8x32xf32>
    %c0_6 = arith.constant 0 : index
    %c0_7 = arith.constant 0 : index
    %8 = vector.load %arg4[%c0_6, %c0_7] : memref<10x32xf32, #tpu.memory_space<vmem>>, vector<10x32xf32>
    %9 = tpu.transpose %7, [1, 0] : vector<8x32xf32> -> vector<32x8xf32>
    %cst_8 = arith.constant dense<0.000000e+00> : vector<10x8xf32>
    %10 = tpu.matmul %8, %9, %cst_8 {dimension_numbers = #tpu.dot_dimension_numbers<[1], [0], [0], [1], [0, 0, 1, 1], [], []>} : vector<10x32xf32>, vector<32x8xf32>, vector<10x8xf32> -> vector<10x8xf32>
    %c0_9 = arith.constant 0 : index
    %c0_10 = arith.constant 0 : index
    %11 = vector.load %arg5[%c0_9, %c0_10] : memref<10x1xf32, #tpu.memory_space<vmem>>, vector<10x1xf32>
    %12 = vector.broadcast %11 : vector<10x1xf32> to vector<10x8xf32>
    %13 = arith.addf %10, %12 : vector<10x8xf32>
    %cst_11 = arith.constant dense<0xFF800000> : vector<8xf32>
    %14 = vector.multi_reduction <maximumf>, %13, %cst_11 [0] : vector<10x8xf32> to vector<8xf32>
    %15 = vector.shape_cast %14 : vector<8xf32> to vector<1x8xf32>
    %16 = vector.broadcast %15 : vector<1x8xf32> to vector<10x8xf32>
    %17 = arith.subf %13, %16 : vector<10x8xf32>
    %18 = math.exp %17 : vector<10x8xf32>
    %cst_12 = arith.constant dense<0.000000e+00> : vector<8xf32>
    %19 = vector.multi_reduction <add>, %18, %cst_12 [0] : vector<10x8xf32> to vector<8xf32>
    %20 = vector.shape_cast %19 : vector<8xf32> to vector<1x8xf32>
    %21 = math.log %20 : vector<1x8xf32>
    %22 = vector.broadcast %21 : vector<1x8xf32> to vector<10x8xf32>
    %23 = arith.subf %17, %22 : vector<10x8xf32>
    %c0_13 = arith.constant 0 : index
    %c0_14 = arith.constant 0 : index
    %24 = vector.load %arg6[%c0_13, %c0_14] : memref<10x8xf32, #tpu.memory_space<vmem>>, vector<10x8xf32>
    tpu.vector_store %arg6[%c0_13, %c0_14], %23 {strides = array<i32>} : memref<10x8xf32, #tpu.memory_space<vmem>>, vector<10x8xf32>,
    return
  }
  func.func @transform_0(%arg0: i32) -> (i32, i32) {
    %c0_i32 = arith.constant 0 : i32
    %c0_i32_0 = arith.constant 0 : i32
    return %arg0, %c0_i32 : i32, i32
  }
  func.func @transform_1(%arg0: i32) -> (i32, i32) {
    %c0_i32 = arith.constant 0 : i32
    %c0_i32_0 = arith.constant 0 : i32
    %c0_i32_1 = arith.constant 0 : i32
    return %c0_i32, %c0_i32_0 : i32, i32
  }
  func.func @transform_2(%arg0: i32) -> (i32, i32) {
    %c0_i32 = arith.constant 0 : i32
    %c0_i32_0 = arith.constant 0 : i32
    %c0_i32_1 = arith.constant 0 : i32
    return %c0_i32, %c0_i32_0 : i32, i32
  }
  func.func @transform_3(%arg0: i32) -> (i32, i32) {
    %c0_i32 = arith.constant 0 : i32
    %c0_i32_0 = arith.constant 0 : i32
    %c0_i32_1 = arith.constant 0 : i32
    return %c0_i32, %c0_i32_0 : i32, i32
  }
  func.func @transform_4(%arg0: i32) -> (i32, i32) {
    %c0_i32 = arith.constant 0 : i32
    %c0_i32_0 = arith.constant 0 : i32
    %c0_i32_1 = arith.constant 0 : i32
    return %c0_i32, %c0_i32_0 : i32, i32
  }
  func.func @transform_5(%arg0: i32) -> (i32, i32) {
    %c0_i32 = arith.constant 0 : i32
    %c0_i32_0 = arith.constant 0 : i32
    return %c0_i32, %arg0 : i32, i32
  }
}

</mosaic_0001>

<bundles_post_ra>
// kernel: tpu_custom_call.1
= control target key start
LH: loop header
LB: loop body
LE: loop exit
PB: predicated region body
PF: predicated region fallthrough
CT: control target
= control target key end

     0   :  { %vm33_vm0 = vcmask 523264   ;;  %v154_v10 = vmov 0   ;;  %vm72_vm1 = vcmask 261120   ;;  %vm105_vm2 = vcmask 64512   ;;  %s239_s1 = inlined_call_operand.vmem [shape: f32[64,32], index: 1, kind: input, shape index: {}]   ;;  %s240_s2 = inlined_call_operand.vmem [shape: f32[1,32], index: 2, kind: input, shape index: {}]   ;;  %s241_s0 = inlined_call_operand.vmem [shape: f32[8,64], index: 0, kind: input, shape index: {}]   ;;  %s242_s4 = inlined_call_operand.vmem [shape: f32[10,1], index: 4, kind: input, shape index: {}]   ;;  %s243_s3 = inlined_call_operand.vmem [shape: f32[10,32], index: 3, kind: input, shape index: {}]   ;;  %s244_s5 = inlined_call_operand.vmem [shape: f32[10,8], index: 5, kind: output, shape index: {}]  }
   0x1   :  { %v28_v0 = vld [vmem:[%s239_s1 + $0x38] sm:$0xff]  ;;  %v27_v1 = vld [vmem:[%s239_s1 + $0x30] sm:$0xff]  ;;  %v26_v2 = vld [vmem:[%s239_s1 + $0x28] sm:$0xff]  ;;  %146 = vset.pattern.permute.xlu0 %v154_v10  ;;  %vm107_vm3 = vcmask 58368  }
   0x2   :  { %45 = vmatpush.msra.mxu0 %v28_v0  ;;  %v25_v3 = vld [vmem:[%s239_s1 + $0x20] sm:$0xff]  ;;  %v24_v4 = vld [vmem:[%s239_s1 + $0x18] sm:$0xff]  ;;  %v23_v5 = vld [vmem:[%s239_s1 + $0x10] sm:$0xff] }
   0x3   :  { %v22_v6 = vld [vmem:[%s239_s1 + $0x8] sm:$0xff]  ;;  %v21_v7 = vld [vmem:[%s239_s1] sm:$0xff] }
   0x4   :  { %46 = vmatpush.msra.mxu0 %v27_v1  ;;  %v20_v8 = vld [vmem:[%s241_s0] sm:$0xff]  ;;  %v61_v11 = vld [vmem:[%s242_s4 + $0x8] sm:$0x3] }
   0x5   :  { %v60_v9 = vld [vmem:[%s242_s4] sm:$0xff]  ;;  %v59_v17 = vld [vmem:[%s243_s3 + $0x8] sm:$0x3] }
   0x6   :  { %47 = vmatpush.msra.mxu0 %v26_v2  ;;  %64 = vperm.xlu0 %146, %v60_v9   ;;  %v147_v12 = vld [vmem:[%s240_s2] ss:$0 sm:$0xff] }
   0x7   :  { %v58_v16 = vld [vmem:[%s243_s3] sm:$0xff] }
   0x8   :  { %48 = vmatpush.msra.mxu0 %v25_v3 }
   0xa   :  { %49 = vmatpush.msra.mxu0 %v24_v4 }
   0xc   :  { %50 = vmatpush.msra.mxu0 %v23_v5 }
   0xe   :  { %51 = vmatpush.msra.mxu0 %v22_v6  ;;  %69 = vperm.xlu0 %146, %v61_v11  }
  0x10   :  { %52 = vmatpush.msra.mxu0 %v21_v7 }
  0x11   :  { %141 = vmatmul.msk.f32.vlgmr.msra.gmra.mxu0 %vm33_vm0, %v20_v8 }
  0x78   :  { %v65_v18 = vpop.permute.xlu0 %64 }
  0x80   :  { %v70_v21 = vpop.permute.xlu0 %69 }
  0x8e   :  { %v54_v13 = vpop.f32.mrf.mxu0 }
  0x8f   :  { %v55_v14 = vadd.f32 %v147_v12, %v54_v13 }
  0x91   :  { %v57_v15 = vmax.f32 %v55_v14, 0.0 }
  0x93   :  { %142 = vmatpush.xpose.msk.msra.mxu1 %vm72_vm1, %v57_v15 }
  0x96   :  { %143 = vmatmul.msk.f32.vlgmr.msra.gmra.mxu1 %vm72_vm1, %v58_v16 }
  0x9e   :  { %144 = vmatmul.msk.f32.gmra.mxu1 %vm72_vm1, %v59_v17 }
 0x113   :  { %v99_v19 = vpop.f32.mrf.mxu1 }
 0x114   :  { %v100_v20 = vadd.f32 %v99_v19, %v65_v18 }
 0x116   :  { %v106_v24 = vsel %vm105_vm2, %v100_v20, -inf }
 0x11b   :  { %v102_v22 = vpop.f32.mrf.mxu1 }
 0x11c   :  { %v103_v23 = vadd.f32 %v102_v22, %v70_v21 }
 0x11e   :  { %v108_v25 = vsel %vm107_vm3, %v103_v23, -inf }
 0x11f   :  { %v109_v26 = vmax.f32 %v106_v24, %v108_v25 }
 0x121   :  { %v110_v27 = vrot.slane %v109_v26, 4 }
 0x123   :  { %v111_v28 = vmax.f32 %v109_v26, %v110_v27 }
 0x125   :  { %v112_v29 = vrot.slane %v111_v28, 2 }
 0x127   :  { %v113_v30 = vmax.f32 %v111_v28, %v112_v29 }
 0x129   :  { %v114_v31 = vrot.slane %v113_v30, 1 }
 0x12b   :  { %v115_v32 = vmax.f32 %v113_v30, %v114_v31 }
 0x12d   :  { %v116_v33 = vsub.f32 %v100_v20, %v115_v32  ;;  %v117_v34 = vsub.f32 %v103_v23, %v115_v32 }
 0x12f   :  { %v118_v35 = vmul.f32 1.442695, %v116_v33  ;;  %v120_v36 = vmul.f32 1.442695, %v117_v34 }
 0x131   :  { %148 = vpow2.f32 %v118_v35 }
 0x132   :  { %150 = vpow2.f32 %v120_v36 }
 0x137   :  { %v149_v37 = vpop.eup %148 }
 0x138   :  { %v151_v38 = vpop.eup %150  ;;  %v122_v39 = vsel %vm105_vm2, %v149_v37, 0.0 }
 0x139   :  { %v123_v40 = vsel %vm107_vm3, %v151_v38, 0.0 }
 0x13a   :  { %v124_v41 = vadd.f32 %v123_v40, %v122_v39 }
 0x13c   :  { %v125_v42 = vrot.slane %v124_v41, 4 }
 0x13e   :  { %v126_v43 = vadd.f32 %v125_v42, %v124_v41 }
 0x140   :  { %v127_v44 = vrot.slane %v126_v43, 2 }
 0x142   :  { %v128_v45 = vadd.f32 %v127_v44, %v126_v43 }
 0x144   :  { %v129_v46 = vrot.slane %v128_v45, 1 }
 0x146   :  { %v130_v47 = vadd.f32 %v129_v46, %v128_v45 }
 0x148   :  { %152 = vlog2.f32 %v130_v47 }
 0x14e   :  { %v153_v48 = vpop.eup %152 }
 0x14f   :  { %v132_v49 = vmul.f32 0.6931472, %v153_v48 }
 0x151   :  { %v133_v50 = vsub.f32 %v116_v33, %v132_v49  ;;  %v134_v51 = vsub.f32 %v117_v34, %v132_v49 }
 0x153   :  { %135 = vst.msk [vmem:[%s244_s5] sm:$0xff] %vm105_vm2, %v133_v50 }
 0x154   :  { %136 = vst.msk [vmem:[%s244_s5 + $0x8] sm:$0x3] %vm107_vm3, %v134_v51 }

</bundles_post_ra>
